<compile_context>
chip_gen: v7x
topology: tpu7x:2x2x1
jax: 0.10.0
libtpu: 0.0.40
codegen_flags: <defaults>
</compile_context>

<pallas_src>
import functools
import math

import numpy as np
import jax
import jax.numpy as jnp
from jax.experimental import pallas as pl
from jax.experimental.pallas import tpu as pltpu


# ----------------------------------------------------------------------------
# Static planning helpers (pure Python ints, evaluated at trace/init time)
# ----------------------------------------------------------------------------
def _phase_taps(K, s, p):
    """Sub-pixel decomposition of a 1-D transposed conv.

    For output phase r in [0, s):  out[s*q + r] = sum_{(k, d)} x[q + d] * w[k]
    where the (k, d) pairs (kernel tap, input offset) are returned here.
    """
    taps = []
    for r in range(s):
        taps.append([(k, (r + p - k) // s)
                     for k in range(K) if (r + p - k) % s == 0])
    return taps


def _vmem_capacity_bytes():
    """Chip VMEM capacity with a conservative (v7x, 64 MiB) fallback."""
    try:
        cap = int(getattr(pltpu.get_tpu_info(), "vmem_capacity_bytes"))
        if cap > 0:
            return cap
    except Exception:
        pass
    return 64 * 2 ** 20


def _build_deconv_plan(wt, b, *, stride, padding, w1x1=None, b1x1=None,
                       compute_dtype=jnp.bfloat16):
    """One-time weight relayout for a fused ConvTranspose2d(+ReLU)(+1x1 conv).

    Returns a plan dict holding:
      lhs    : (s*s*Cout, U*Cin_pad) stacked-phase weight (bf16), zero for
               (phase, union-offset) combos without a tap and for pad channels
      b_col  : (s*s*Cout, 1) bias column (phase-major, channel-minor)
      w1_bd  : optional (s*s*C_final, s*s*Cout) block-diagonal 1x1 weight (f32)
      b1_col : optional (s*s*C_final, 1)
      plus the static tap/halo metadata used by the wrapper.
    """
    s, p = int(stride), int(padding)
    cin_total, cout, K, K2 = (int(d) for d in wt.shape)
    assert K == K2 and s >= 1 and p >= 0 and K >= 1
    if (K - 2 * p) % s != 0:
        # TODO(synk): support (kernel_size - 2*padding) % stride != 0 (ragged phases).
        raise NotImplementedError(
            "requires (kernel_size - 2*padding) % stride == 0")

    taps = _phase_taps(K, s, p)
    ds = [d for t in taps for (_, d) in t]
    dmin, dmax = min(ds), max(ds)
    pb = max(0, -dmin)                           # top/left zero halo
    union = tuple(sorted({d + pb for d in ds}))  # distinct padded offsets (1-D)
    U1 = len(union)
    oc_max = dmax + pb

    # Pad the channel dim so every im2col row-group is sublane-tile aligned
    # (16 rows for bf16, 8 for f32): aligned, unmasked scratch stores.
    sub = 8 * max(1, 4 // jnp.dtype(compute_dtype).itemsize)
    cin_pad = -(-cin_total // sub) * sub

    wt_np = np.asarray(jax.device_get(wt), np.float32)
    lhs = np.zeros((s * s * cout, U1 * U1 * cin_pad), np.float32)
    for rh in range(s):
        for rw in range(s):
            ph = rh * s + rw
            for (kh, dh) in taps[rh]:
                for (kw, dw) in taps[rw]:
                    u = union.index(dh + pb) * U1 + union.index(dw + pb)
                    lhs[ph * cout:(ph + 1) * cout,
                        u * cin_pad:u * cin_pad + cin_total] = \
                        wt_np[:, :, kh, kw].T
    b_np = np.asarray(jax.device_get(b), np.float32)
    b_col = np.tile(b_np, s * s).reshape(s * s * cout, 1)

    plan = dict(
        s=s, p=p, K=K, cin_total=cin_total, cin_pad=cin_pad, cout=cout,
        pb=pb, dmax=dmax, oc_max=oc_max, union=union, U1=U1,
        compute_dtype=compute_dtype,
        lhs=jnp.asarray(lhs, compute_dtype),
        b_col=jnp.asarray(b_col, jnp.float32),
        fuse=w1x1 is not None)

    if w1x1 is not None:
        w1_np = np.asarray(jax.device_get(w1x1), np.float32)   # (Cout, C_final)
        b1_np = np.asarray(jax.device_get(b1x1), np.float32)
        assert w1_np.shape[0] == cout
        c_final = int(w1_np.shape[1])
        w1_bd = np.kron(np.eye(s * s, dtype=np.float32), w1_np.T)
        b1_col = np.tile(b1_np, s * s).reshape(s * s * c_final, 1)
        plan.update(c_final=c_final,
                    w1_bd=jnp.asarray(w1_bd, jnp.float32),
                    b1_col=jnp.asarray(b1_col, jnp.float32))
    else:
        plan.update(c_final=cout)
    return plan


def _plan_tiles(Qh, Qw, W, plan, out_dtype, N, max_rows_per_tile, vmem_budget):
    """Pick (TQ, Wpp) : output-row tile size and lane-padded row width."""
    pb, dmax, oc_max = plan['pb'], plan['dmax'], plan['oc_max']
    cin_pad = plan['cin_pad']
    U = plan['U1'] ** 2
    rows_out = plan['s'] ** 2 * plan['c_final']
    rows_w = plan['s'] ** 2 * plan['cout']
    bpe_c = jnp.dtype(plan['compute_dtype']).itemsize
    bpe_o = jnp.dtype(out_dtype).itemsize

    extra = 1 if oc_max > 0 else 0
    halo = oc_max + extra
    Wpp_min = max(W + pb + max(0, Qw + dmax - W), oc_max)

    weights_bytes = int(plan['lhs'].size) * bpe_c + rows_w * 4
    if plan['fuse']:
        weights_bytes += int(plan['w1_bd'].size) * 4 + rows_out * 4

    divisors = sorted((d for d in range(1, Qh + 1) if Qh % d == 0),
                      reverse=True)
    if max_rows_per_tile is not None:
        capped = [d for d in divisors if d <= max_rows_per_tile]
        divisors = capped or [min(divisors)]

    def aligned_wpp(tq):
        # pad Wpp so L = tq*Wpp is a multiple of 128 lanes (unmasked stores),
        # unless the padding overhead would exceed 2x.
        align = 128 // math.gcd(tq, 128)
        w_al = -(-Wpp_min // align) * align
        return w_al if w_al <= 2 * Wpp_min else Wpp_min

    def working_set(tq, wpp):
        L = tq * wpp
        lbuf = (tq + halo) * wpp
        return (2 * cin_pad * lbuf * bpe_c        # double-buffered input tile
                + U * cin_pad * L * bpe_c         # im2col (union-offset) scratch
                + 2 * rows_out * L * bpe_o        # double-buffered output tile
                + 2 * weights_bytes)

    best = None
    for tq in divisors:
        wpp = aligned_wpp(tq)
        if working_set(tq, wpp) > vmem_budget:
            continue
        # keep >= 2 grid steps when possible so both v7x TensorCores get work
        if N * (Qh // tq) < 2 and any(d != tq for d in divisors):
            continue
        best = (tq, wpp)
        break
    if best is None:
        tq = min(divisors)
        best = (tq, aligned_wpp(tq))
        if working_set(*best) > vmem_budget:
            best = (tq, Wpp_min)
    return best[0], best[1], halo, extra


# ----------------------------------------------------------------------------
# Pallas kernel: fused ConvTranspose2d (+ ReLU) (+ 1x1 Conv2d), stacked phases
# ----------------------------------------------------------------------------
def _deconv_stacked_kernel(x_ref, lhs_ref, b_ref, *rest,
                           union_offs, cin_pad, L, fuse):
    if fuse:
        w1_ref, b1_ref, out_ref, rhs_ref = rest
    else:
        out_ref, rhs_ref = rest

    # im2col of the UNION of distinct tap offsets into the VMEM scratch:
    # sublanes = (union offset, channel), lanes = flattened output tile.
    # Every store is a full, sublane-aligned (cin_pad, L) block (static slices).
    for u, off in enumerate(union_offs):
        rhs_ref[u * cin_pad:(u + 1) * cin_pad, :] = x_ref[0, :, off:off + L]

    # ONE stacked-phase MXU matmul per tile: bf16 x bf16 -> f32 accumulate.
    acc = jnp.dot(lhs_ref[...], rhs_ref[...],
                  preferred_element_type=jnp.float32)      # (s*s*Cout, L)
    acc = jnp.maximum(acc + b_ref[...], 0.0)               # bias + ReLU, f32
    if fuse:                                               # fused 1x1 conv:
        acc = jnp.dot(w1_ref[...], acc,                    # block-diag f32 LHS
                      preferred_element_type=jnp.float32) + b1_ref[...]
    out_ref[0, :, :] = acc.astype(out_ref.dtype)           # lane-dense store


# ----------------------------------------------------------------------------
# Wrapper: tiling plan, input prep, pallas_call, phase interleave
# ----------------------------------------------------------------------------
def deconv_transpose_relu(inputs, plan, *, out_dtype=jnp.float32,
                          max_rows_per_tile=None, vmem_budget_bytes=None):
    """ConvTranspose2d(cat(inputs, dim=1)) + ReLU (+ optional fused 1x1 conv).

    inputs : list of NCHW arrays (channel-concat fused into the prep pass)
    plan   : dict from _build_deconv_plan (weights already relaid out)
    returns NCHW (N, C_final, Ho, Wo)
    """
    s, p, K = plan['s'], plan['p'], plan['K']
    cdt = plan['compute_dtype']
    cin_total, cin_pad = plan['cin_total'], plan['cin_pad']
    N, _, H, W = (int(d) for d in inputs[0].shape)
    assert sum(int(a.shape[1]) for a in inputs) == cin_total

    Ho = (H - 1) * s - 2 * p + K
    Wo = (W - 1) * s - 2 * p + K
    assert Ho > 0 and Wo > 0 and Ho % s == 0 and Wo % s == 0
    Qh, Qw = Ho // s, Wo // s

    vmem_cap = _vmem_capacity_bytes()
    if vmem_budget_bytes is None:
        # v5e/v6e (128 MiB): ~42 MiB row-tile budget; v7x (64 MiB): ~21 MiB.
        vmem_budget_bytes = max(8 * 2 ** 20, min(48 * 2 ** 20, vmem_cap // 3))

    TQ, Wpp, halo, extra = _plan_tiles(Qh, Qw, W, plan, out_dtype, N,
                                       max_rows_per_tile, vmem_budget_bytes)
    n_tiles = Qh // TQ
    L = TQ * Wpp
    pb, dmax, oc_max = plan['pb'], plan['dmax'], plan['oc_max']
    pa_w = Wpp - W - pb
    pa_h = max(0, Qh + dmax + extra - H)
    Hp = H + pb + pa_h
    # static safety checks: flat tap-window reads must stay inside the buffer
    assert pa_w >= 0 and Wpp >= oc_max and Wpp >= Qw + oc_max

    union = plan['union']
    U1 = plan['U1']
    union_offs = tuple(oh * Wpp + ow for oh in union for ow in union)

    if n_tiles == 1:
        Lbuf = Hp * Wpp                       # no halo duplication at all
        assert Hp >= TQ + halo
    else:
        Lbuf = (TQ + halo) * Wpp
    assert max(union_offs) + L <= Lbuf

    # ---- one fused concat + channel-pad + spatial-pad + cast + tile pass
    x = inputs[0] if len(inputs) == 1 else jnp.concatenate(inputs, axis=1)
    x = jnp.pad(x, ((0, 0), (0, cin_pad - cin_total), (pb, pa_h), (pb, pa_w)))
    xf = x.astype(cdt).reshape(N, cin_pad, Hp * Wpp)
    if n_tiles == 1:
        xs = xf
    else:
        # TODO(synk): avoid duplicating halo rows in HBM (pl.ANY + manual DMA)
        # when n_tiles > 1; with the larger VMEM budget this path is rare.
        pieces = [xf[:, :, t * TQ * Wpp: t * TQ * Wpp + Lbuf]
                  for t in range(n_tiles)]
        xs = jnp.stack(pieces, axis=1).reshape(N * n_tiles, cin_pad, Lbuf)

    rows_out = s * s * plan['c_final']
    fuse = plan['fuse']
    kernel = functools.partial(_deconv_stacked_kernel,
                               union_offs=union_offs, cin_pad=cin_pad,
                               L=L, fuse=fuse)

    in_specs = [pl.BlockSpec((1, cin_pad, Lbuf), lambda i: (i, 0, 0)),
                pl.BlockSpec(tuple(plan['lhs'].shape), lambda i: (0, 0)),
                pl.BlockSpec(tuple(plan['b_col'].shape), lambda i: (0, 0))]
    args = [xs, plan['lhs'], plan['b_col']]
    if fuse:
        in_specs += [pl.BlockSpec(tuple(plan['w1_bd'].shape), lambda i: (0, 0)),
                     pl.BlockSpec(tuple(plan['b1_col'].shape), lambda i: (0, 0))]
        args += [plan['w1_bd'], plan['b1_col']]

    out_shape = jax.ShapeDtypeStruct((N * n_tiles, rows_out, L), out_dtype)
    out_specs = pl.BlockSpec((1, rows_out, L), lambda i: (i, 0, 0))

    # per-step VMEM estimate; limit clamped under the chip's physical VMEM
    bpe_c = jnp.dtype(cdt).itemsize
    est = (2 * cin_pad * Lbuf * bpe_c
           + U1 * U1 * cin_pad * L * bpe_c
           + 2 * rows_out * L * jnp.dtype(out_dtype).itemsize
           + 2 * (int(plan['lhs'].size) * bpe_c + rows_out * 4
                  + (int(plan['w1_bd'].size) * 4 if fuse else 0))
           + (2 << 20))
    vmem_limit = int(min(max(32 * 2 ** 20, 2 * est), vmem_cap - 8 * 2 ** 20))

    y = pl.pallas_call(
        kernel,
        out_shape=out_shape,
        grid=(N * n_tiles,),
        in_specs=in_specs,
        out_specs=out_specs,
        scratch_shapes=[pltpu.VMEM((U1 * U1 * cin_pad, L), cdt)],
        compiler_params=pltpu.CompilerParams(
            dimension_semantics=("parallel",),
            vmem_limit_bytes=vmem_limit),
    )(*args)

    # ---- interleave sub-pixel phases back to NCHW (layout plumbing only)
    c_final = plan['c_final']
    y = y.reshape(N, n_tiles, s, s, c_final, TQ, Wpp)[..., :Qw]
    y = jnp.transpose(y, (0, 4, 1, 5, 2, 6, 3))   # N, C, tile, q, rh, qw, rw
    return y.reshape(N, c_final, Ho, Wo)


# ----------------------------------------------------------------------------
# Decoder module (mirrors the PyTorch __init__ / forward)
# ----------------------------------------------------------------------------
class DecoderPallas:
    def __init__(self, config, effect_dim, key):
        self.config = config
        self.effect_dim = effect_dim
        bc = config['base_channels'] * 2 ** (config['num_layers'] - 1)
        K = config['kernel_size']
        keys = jax.random.split(key, 2 * config['num_layers'] + 2)
        self.deconv_params = []
        ki = 0
        for _ in range(config['num_layers']):
            cin = bc + effect_dim
            cout = bc // 2
            bound = 1.0 / np.sqrt(cin * K * K)
            w = jax.random.uniform(keys[ki], (cin, cout, K, K), jnp.float32,
                                   -bound, bound)
            bb = jax.random.uniform(keys[ki + 1], (cout,), jnp.float32,
                                    -bound, bound)
            self.deconv_params.append((w, bb))
            ki += 2
            bc //= 2
        out_ch = config['out_channels']
        bound = 1.0 / np.sqrt(bc)
        self.w_final = jax.random.uniform(keys[ki], (bc, out_ch), jnp.float32,
                                          -bound, bound)
        self.b_final = jax.random.uniform(keys[ki + 1], (out_ch,), jnp.float32,
                                          -bound, bound)

        # Hoisted per-layer weight relayout (stacked-phase LHS, bias columns,
        # fused block-diagonal 1x1) -- built ONCE here, reused on every call.
        nL = config['num_layers']
        self.plans = []
        for li, (w, b) in enumerate(self.deconv_params):
            last = li == nL - 1
            self.plans.append(_build_deconv_plan(
                w, b, stride=config['stride'], padding=config['padding'],
                w1x1=self.w_final if last else None,
                b1x1=self.b_final if last else None,
                compute_dtype=jnp.bfloat16))

    def __call__(self, x, effect_embed, *, max_rows_per_tile=None):
        # torch.cat([x, effect_embed], dim=1) is fused into the first layer's
        # input-prep pass; the final 1x1 conv is fused into the last kernel.
        inputs = [x, effect_embed]
        nL = self.config['num_layers']
        out = None
        for li, plan in enumerate(self.plans):
            last = li == nL - 1
            # TODO(synk): for num_layers > 1 keep activations in the
            # phase-major tiled layout between layers instead of interleaving
            # back to NCHW and re-tiling.
            out = deconv_transpose_relu(
                inputs, plan,
                out_dtype=jnp.float32 if last else jnp.bfloat16,
                max_rows_per_tile=max_rows_per_tile)
            inputs = [out]
        return out


# ----------------------------------------------------------------------------
# Pure numpy reference with PyTorch ConvTranspose2d scatter semantics
# ----------------------------------------------------------------------------
def _ref_convtranspose2d(x, w, b, s, p):
    N, cin, H, W = x.shape
    _, cout, K, _ = w.shape
    Ho = (H - 1) * s - 2 * p + K
    Wo = (W - 1) * s - 2 * p + K
    out = np.zeros((N, cout, Ho, Wo), np.float32)
    for ih in range(H):
        for iw in range(W):
            for kh in range(K):
                for kw in range(K):
                    oh = ih * s - p + kh
                    ow = iw * s - p + kw
                    if 0 <= oh < Ho and 0 <= ow < Wo:
                        out[:, :, oh, ow] += x[:, :, ih, iw] @ w[:, :, kh, kw]
    return out + b[None, :, None, None]


def _bf16(a):
    # mirror the kernel's bf16 MXU-operand rounding in the reference
    return np.asarray(jnp.asarray(a).astype(jnp.bfloat16).astype(jnp.float32))


def _reference(dec, config, x, eff):
    cur = np.concatenate([_bf16(x), _bf16(eff)], axis=1)
    for w, b in dec.deconv_params:
        cur = np.maximum(
            _ref_convtranspose2d(cur, _bf16(w), np.asarray(b),
                                 config['stride'], config['padding']), 0.0)
    return (np.einsum('nchw,cd->ndhw', cur, np.asarray(dec.w_final))
            + np.asarray(dec.b_final)[None, :, None, None])


if __name__ == "__main__":
    # NOTE: the PyTorch module as written only type-checks for num_layers == 1
    # (deeper layers expect effect_dim extra channels that the forward never
    # re-concatenates), so the demo uses num_layers = 1.
    config = dict(base_channels=8, num_layers=1, out_channels=1,
                  kernel_size=4, stride=2, padding=1)
    effect_dim = 4

    key = jax.random.PRNGKey(0)
    k_param, k_x, k_e, k_x2, k_e2 = jax.random.split(key, 5)
    dec = DecoderPallas(config, effect_dim, k_param)
    cin = config['base_channels'] * 2 ** (config['num_layers'] - 1)

    # case 1: small spatial extent, single row tile per image, grid = (2,)
    N, H, W = 2, 8, 8
    x = jax.random.normal(k_x, (N, cin, H, W), jnp.float32)
    eff = jax.random.normal(k_e, (N, effect_dim, H, W), jnp.float32)
    out = jax.block_until_ready(dec(x, eff))
    ref = _reference(dec, config, x, eff)
    assert out.shape == ref.shape == (N, config['out_channels'], 2 * H, 2 * W)
    np.testing.assert_allclose(np.asarray(out), ref, rtol=5e-4, atol=5e-4)

    # case 2: larger spatial extent with forced row tiling: grid = (4,),
    # exercising the halo'd row tiles and the 128-lane-aligned output blocks.
    H2 = W2 = 16
    x2 = jax.random.normal(k_x2, (N, cin, H2, W2), jnp.float32)
    eff2 = jax.random.normal(k_e2, (N, effect_dim, H2, W2), jnp.float32)
    out2 = jax.block_until_ready(dec(x2, eff2, max_rows_per_tile=8))
    ref2 = _reference(dec, config, x2, eff2)
    assert out2.shape == ref2.shape == (N, config['out_channels'], 2 * H2, 2 * W2)
    np.testing.assert_allclose(np.asarray(out2), ref2, rtol=5e-4, atol=5e-4)

    print("KERNEL_OK")
</pallas_src>

<mosaic_0001>
module attributes {stable_mosaic.version = 11 : i64} {
  func.func @_deconv_stacked_kernel(%arg0: i32, %arg1: memref<1x16x176xbf16, #tpu.memory_space<vmem>>, %arg2: memref<16x144xbf16, #tpu.memory_space<vmem>>, %arg3: memref<16x1xf32, #tpu.memory_space<vmem>>, %arg4: memref<4x16xf32, #tpu.memory_space<vmem>>, %arg5: memref<4x1xf32, #tpu.memory_space<vmem>>, %arg6: memref<1x4x128xf32, #tpu.memory_space<vmem>>, %arg7: memref<144x128xbf16, #tpu.memory_space<vmem>>) attributes {dimension_semantics = [#tpu.dimension_semantics<parallel>], iteration_bounds = array<i64: 2>, scalar_prefetch = 0 : i64, scratch_operands = 1 : i64, tpu.core_type = #tpu.core_type<tc>, window_params = [{transform_indices = @transform_0, window_bounds = array<i64: 1, 16, 176>}, {pipeline_mode = #tpu.pipeline_mode<synchronous>, transform_indices = @transform_1, window_bounds = array<i64: 16, 144>}, {pipeline_mode = #tpu.pipeline_mode<synchronous>, transform_indices = @transform_2, window_bounds = array<i64: 16, 1>}, {pipeline_mode = #tpu.pipeline_mode<synchronous>, transform_indices = @transform_3, window_bounds = array<i64: 4, 16>}, {pipeline_mode = #tpu.pipeline_mode<synchronous>, transform_indices = @transform_4, window_bounds = array<i64: 4, 1>}, {transform_indices = @transform_5, window_bounds = array<i64: 1, 4, 128>}]} {
    %c0 = arith.constant 0 : index
    %c0_0 = arith.constant 0 : index
    %c0_1 = arith.constant 0 : index
    %0 = vector.load %arg1[%c0, %c0_0, %c0_1] : memref<1x16x176xbf16, #tpu.memory_space<vmem>>, vector<1x16x128xbf16>
    %1 = vector.shape_cast %0 : vector<1x16x128xbf16> to vector<16x128xbf16>
    %c0_2 = arith.constant 0 : index
    %c0_3 = arith.constant 0 : index
    %2 = vector.load %arg7[%c0_2, %c0_3] : memref<144x128xbf16, #tpu.memory_space<vmem>>, vector<16x128xbf16>
    tpu.vector_store %arg7[%c0_2, %c0_3], %1 {strides = array<i32>} : memref<144x128xbf16, #tpu.memory_space<vmem>>, vector<16x128xbf16>,
    %c0_4 = arith.constant 0 : index
    %c0_5 = arith.constant 0 : index
    %c1 = arith.constant 1 : index
    %3 = vector.load %arg1[%c0_4, %c0_5, %c1] : memref<1x16x176xbf16, #tpu.memory_space<vmem>>, vector<1x16x128xbf16>
    %4 = vector.shape_cast %3 : vector<1x16x128xbf16> to vector<16x128xbf16>
    %c16 = arith.constant 16 : index
    %c0_6 = arith.constant 0 : index
    %5 = vector.load %arg7[%c16, %c0_6] : memref<144x128xbf16, #tpu.memory_space<vmem>>, vector<16x128xbf16>
    tpu.vector_store %arg7[%c16, %c0_6], %4 {strides = array<i32>} : memref<144x128xbf16, #tpu.memory_space<vmem>>, vector<16x128xbf16>,
    %c0_7 = arith.constant 0 : index
    %c0_8 = arith.constant 0 : index
    %c2 = arith.constant 2 : index
    %6 = vector.load %arg1[%c0_7, %c0_8, %c2] : memref<1x16x176xbf16, #tpu.memory_space<vmem>>, vector<1x16x128xbf16>
    %7 = vector.shape_cast %6 : vector<1x16x128xbf16> to vector<16x128xbf16>
    %c32 = arith.constant 32 : index
    %c0_9 = arith.constant 0 : index
    %8 = vector.load %arg7[%c32, %c0_9] : memref<144x128xbf16, #tpu.memory_space<vmem>>, vector<16x128xbf16>
    tpu.vector_store %arg7[%c32, %c0_9], %7 {strides = array<i32>} : memref<144x128xbf16, #tpu.memory_space<vmem>>, vector<16x128xbf16>,
    %c0_10 = arith.constant 0 : index
    %c0_11 = arith.constant 0 : index
    %c16_12 = arith.constant 16 : index
    %9 = vector.load %arg1[%c0_10, %c0_11, %c16_12] : memref<1x16x176xbf16, #tpu.memory_space<vmem>>, vector<1x16x128xbf16>
    %10 = vector.shape_cast %9 : vector<1x16x128xbf16> to vector<16x128xbf16>
    %c48 = arith.constant 48 : index
    %c0_13 = arith.constant 0 : index
    %11 = vector.load %arg7[%c48, %c0_13] : memref<144x128xbf16, #tpu.memory_space<vmem>>, vector<16x128xbf16>
    tpu.vector_store %arg7[%c48, %c0_13], %10 {strides = array<i32>} : memref<144x128xbf16, #tpu.memory_space<vmem>>, vector<16x128xbf16>,
    %c0_14 = arith.constant 0 : index
    %c0_15 = arith.constant 0 : index
    %c17 = arith.constant 17 : index
    %12 = vector.load %arg1[%c0_14, %c0_15, %c17] : memref<1x16x176xbf16, #tpu.memory_space<vmem>>, vector<1x16x128xbf16>
    %13 = vector.shape_cast %12 : vector<1x16x128xbf16> to vector<16x128xbf16>
    %c64 = arith.constant 64 : index
    %c0_16 = arith.constant 0 : index
    %14 = vector.load %arg7[%c64, %c0_16] : memref<144x128xbf16, #tpu.memory_space<vmem>>, vector<16x128xbf16>
    tpu.vector_store %arg7[%c64, %c0_16], %13 {strides = array<i32>} : memref<144x128xbf16, #tpu.memory_space<vmem>>, vector<16x128xbf16>,
    %c0_17 = arith.constant 0 : index
    %c0_18 = arith.constant 0 : index
    %c18 = arith.constant 18 : index
    %15 = vector.load %arg1[%c0_17, %c0_18, %c18] : memref<1x16x176xbf16, #tpu.memory_space<vmem>>, vector<1x16x128xbf16>
    %16 = vector.shape_cast %15 : vector<1x16x128xbf16> to vector<16x128xbf16>
    %c80 = arith.constant 80 : index
    %c0_19 = arith.constant 0 : index
    %17 = vector.load %arg7[%c80, %c0_19] : memref<144x128xbf16, #tpu.memory_space<vmem>>, vector<16x128xbf16>
    tpu.vector_store %arg7[%c80, %c0_19], %16 {strides = array<i32>} : memref<144x128xbf16, #tpu.memory_space<vmem>>, vector<16x128xbf16>,
    %c0_20 = arith.constant 0 : index
    %c0_21 = arith.constant 0 : index
    %c32_22 = arith.constant 32 : index
    %18 = vector.load %arg1[%c0_20, %c0_21, %c32_22] : memref<1x16x176xbf16, #tpu.memory_space<vmem>>, vector<1x16x128xbf16>
    %19 = vector.shape_cast %18 : vector<1x16x128xbf16> to vector<16x128xbf16>
    %c96 = arith.constant 96 : index
    %c0_23 = arith.constant 0 : index
    %20 = vector.load %arg7[%c96, %c0_23] : memref<144x128xbf16, #tpu.memory_space<vmem>>, vector<16x128xbf16>
    tpu.vector_store %arg7[%c96, %c0_23], %19 {strides = array<i32>} : memref<144x128xbf16, #tpu.memory_space<vmem>>, vector<16x128xbf16>,
    %c0_24 = arith.constant 0 : index
    %c0_25 = arith.constant 0 : index
    %c33 = arith.constant 33 : index
    %21 = vector.load %arg1[%c0_24, %c0_25, %c33] : memref<1x16x176xbf16, #tpu.memory_space<vmem>>, vector<1x16x128xbf16>
    %22 = vector.shape_cast %21 : vector<1x16x128xbf16> to vector<16x128xbf16>
    %c112 = arith.constant 112 : index
    %c0_26 = arith.constant 0 : index
    %23 = vector.load %arg7[%c112, %c0_26] : memref<144x128xbf16, #tpu.memory_space<vmem>>, vector<16x128xbf16>
    tpu.vector_store %arg7[%c112, %c0_26], %22 {strides = array<i32>} : memref<144x128xbf16, #tpu.memory_space<vmem>>, vector<16x128xbf16>,
    %c0_27 = arith.constant 0 : index
    %c0_28 = arith.constant 0 : index
    %c34 = arith.constant 34 : index
    %24 = vector.load %arg1[%c0_27, %c0_28, %c34] : memref<1x16x176xbf16, #tpu.memory_space<vmem>>, vector<1x16x128xbf16>
    %25 = vector.shape_cast %24 : vector<1x16x128xbf16> to vector<16x128xbf16>
    %c128 = arith.constant 128 : index
    %c0_29 = arith.constant 0 : index
    %26 = vector.load %arg7[%c128, %c0_29] : memref<144x128xbf16, #tpu.memory_space<vmem>>, vector<16x128xbf16>
    tpu.vector_store %arg7[%c128, %c0_29], %25 {strides = array<i32>} : memref<144x128xbf16, #tpu.memory_space<vmem>>, vector<16x128xbf16>,
    %c0_30 = arith.constant 0 : index
    %c0_31 = arith.constant 0 : index
    %27 = vector.load %arg2[%c0_30, %c0_31] : memref<16x144xbf16, #tpu.memory_space<vmem>>, vector<16x144xbf16>
    %c0_32 = arith.constant 0 : index
    %c0_33 = arith.constant 0 : index
    %28 = vector.load %arg7[%c0_32, %c0_33] : memref<144x128xbf16, #tpu.memory_space<vmem>>, vector<144x128xbf16>
    %cst = arith.constant dense<0.000000e+00> : vector<16x128xf32>
    %29 = tpu.matmul %27, %28, %cst {dimension_numbers = #tpu.dot_dimension_numbers<[1], [0], [0], [1], [0, 0, 1, 1], [], []>} : vector<16x144xbf16>, vector<144x128xbf16>, vector<16x128xf32> -> vector<16x128xf32>
    %c0_34 = arith.constant 0 : index
    %c0_35 = arith.constant 0 : index
    %30 = vector.load %arg3[%c0_34, %c0_35] : memref<16x1xf32, #tpu.memory_space<vmem>>, vector<16x1xf32>
    %31 = vector.broadcast %30 : vector<16x1xf32> to vector<16x128xf32>
    %32 = arith.addf %29, %31 : vector<16x128xf32>
    %cst_36 = arith.constant 0.000000e+00 : f32
    %33 = vector.broadcast %cst_36 : f32 to vector<16x128xf32>
    %34 = arith.maximumf %32, %33 : vector<16x128xf32>
    %c0_37 = arith.constant 0 : index
    %c0_38 = arith.constant 0 : index
    %35 = vector.load %arg4[%c0_37, %c0_38] : memref<4x16xf32, #tpu.memory_space<vmem>>, vector<4x16xf32>
    %cst_39 = arith.constant dense<0.000000e+00> : vector<4x128xf32>
    %36 = tpu.matmul %35, %34, %cst_39 {dimension_numbers = #tpu.dot_dimension_numbers<[1], [0], [0], [1], [0, 0, 1, 1], [], []>} : vector<4x16xf32>, vector<16x128xf32>, vector<4x128xf32> -> vector<4x128xf32>
    %c0_40 = arith.constant 0 : index
    %c0_41 = arith.constant 0 : index
    %37 = vector.load %arg5[%c0_40, %c0_41] : memref<4x1xf32, #tpu.memory_space<vmem>>, vector<4x1xf32>
    %38 = vector.broadcast %37 : vector<4x1xf32> to vector<4x128xf32>
    %39 = arith.addf %36, %38 : vector<4x128xf32>
    %c0_42 = arith.constant 0 : index
    %c0_43 = arith.constant 0 : index
    %c0_44 = arith.constant 0 : index
    %40 = vector.load %arg6[%c0_42, %c0_43, %c0_44] : memref<1x4x128xf32, #tpu.memory_space<vmem>>, vector<1x4x128xf32>
    %41 = vector.shape_cast %40 : vector<1x4x128xf32> to vector<4x128xf32>
    %42 = vector.shape_cast %39 : vector<4x128xf32> to vector<1x4x128xf32>
    tpu.vector_store %arg6[%c0_42, %c0_43, %c0_44], %42 {strides = array<i32>} : memref<1x4x128xf32, #tpu.memory_space<vmem>>, vector<1x4x128xf32>,
    return
  }
  func.func @transform_0(%arg0: i32) -> (i32, i32, i32) {
    %c0_i32 = arith.constant 0 : i32
    %c0_i32_0 = arith.constant 0 : i32
    %c0_i32_1 = arith.constant 0 : i32
    return %arg0, %c0_i32, %c0_i32_0 : i32, i32, i32
  }
  func.func @transform_1(%arg0: i32) -> (i32, i32) {
    %c0_i32 = arith.constant 0 : i32
    %c0_i32_0 = arith.constant 0 : i32
    %c0_i32_1 = arith.constant 0 : i32
    return %c0_i32, %c0_i32_0 : i32, i32
  }
  func.func @transform_2(%arg0: i32) -> (i32, i32) {
    %c0_i32 = arith.constant 0 : i32
    %c0_i32_0 = arith.constant 0 : i32
    %c0_i32_1 = arith.constant 0 : i32
    return %c0_i32, %c0_i32_0 : i32, i32
  }
  func.func @transform_3(%arg0: i32) -> (i32, i32) {
    %c0_i32 = arith.constant 0 : i32
    %c0_i32_0 = arith.constant 0 : i32
    %c0_i32_1 = arith.constant 0 : i32
    return %c0_i32, %c0_i32_0 : i32, i32
  }
  func.func @transform_4(%arg0: i32) -> (i32, i32) {
    %c0_i32 = arith.constant 0 : i32
    %c0_i32_0 = arith.constant 0 : i32
    %c0_i32_1 = arith.constant 0 : i32
    return %c0_i32, %c0_i32_0 : i32, i32
  }
  func.func @transform_5(%arg0: i32) -> (i32, i32, i32) {
    %c0_i32 = arith.constant 0 : i32
    %c0_i32_0 = arith.constant 0 : i32
    %c0_i32_1 = arith.constant 0 : i32
    return %arg0, %c0_i32, %c0_i32_0 : i32, i32, i32
  }
}

</mosaic_0001>

<bundles_post_ra>
// kernel: tpu_custom_call.1
= control target key start
LH: loop header
LB: loop body
LE: loop exit
PB: predicated region body
PF: predicated region fallthrough
CT: control target
= control target key end

     0   :  { %10 = vsyncpa [#allocation4], 0  ;;  %s1094_s0 = inlined_call_operand.hbm [shape: bf16[2,16,176], index: 0, kind: input, shape index: {}]   ;;  %s1095_s1 = inlined_call_operand.vmem [shape: bf16[16,144], index: 1, kind: input, shape index: {}]   ;;  %s1096_s2 = inlined_call_operand.vmem [shape: f32[16,1], index: 2, kind: input, shape index: {}]   ;;  %s1097_s3 = inlined_call_operand.vmem [shape: f32[4,16], index: 3, kind: input, shape index: {}]   ;;  %s1098_s4 = inlined_call_operand.vmem [shape: f32[4,1], index: 4, kind: input, shape index: {}]   ;;  %s1099_s5 = inlined_call_operand.hbm [shape: f32[2,4,128], index: 5, kind: output, shape index: {}]  }
   0x1   :  { %12 = vsyncpa [#allocation4 + $0x1], 0 }
   0x2   :  { %13 = vsyncpa [#allocation5], 0 }
   0x3   :  { %15 = vsyncpa [#allocation5 + $0x1], 0  ;;  %s902_s18 = smov 0   ;;  %s904_s19 = smov 0  }
   0x4   :  { %s906_s20 = smov 0   ;;  %s908_s21 = smov 0  }
   0x5 LB: > { %s923_s22 = sadd.s32 4294967295, %s854_s21   ;;  %s641_s23 = sadd.s32 4294967294, %s854_s21   ;;  %s854_s21 = sphi %s908_s21, %s1112_s21   ;;  %s850_s20 = sphi %s906_s20, %s1111_s20   ;;  %s846_s19 = sphi %s904_s19, %s1110_s19   ;;  %s842_s18 = sphi %s902_s18, %s1109_s18  }
   0x6   : > { %s927_s24 = sadd.s32 1, %s854_s21   ;;  %s28_s25 = sadd.s32 1, %s850_s20 }
   0x7   : > { %s25_s26 = ssub.s32 %s854_s21, %s927_s24  ;;  %p35_p0 = scmp.ne.s32.totalorder %s850_s20, %s846_s19 }
   0x8   : > { %p26_p1 = scmp.eq.s32.totalorder %s25_s26, 0  ;;  %p36_p2 = scmp.eq.s32.totalorder %s854_s21, 0 }
   0x9   : > { %p41_p3 = scmp.ne.s32.totalorder %s846_s19, %s842_s18  ;;  %p42_p4 = scmp.eq.s32.totalorder %s923_s22, 0 }
   0xa   : > { %s939_s27 = scalar_select %p26_p1, %s850_s20, %s28_s25  }
   0xb   : > { %p941_p5 = por %p36_p2, %p35_p0  ;;  %p945_p6 = por %p42_p4, %p41_p3 }
   0xc   : > { %p149_p7 = scmp.eq.s32.totalorder %s923_s22, 1  ;;  %p155_p8 = scmp.eq.s32.totalorder %s641_s23, 1 }
   0xd   : > { %p701_p10 = scmp.lt.s32.totalorder %s854_s21, 2  ;;  %s187_s7 = sand.u32 1, %s850_s20  }
   0xe   : > { %p952_p11 = por %p149_p7, %p35_p0  ;;  %p956_p12 = por %p155_p8, %p41_p3 }
   0xf   : > { %s675_s8 = sshll.u32 %s854_s21, 8  ;;  %s644_s9 = sshll.u32 %s187_s7, 4 }
  0x10   : > { %s1103_s30 = scalar_select %p952_p11, 1, 0 }
  0x11   : > { %s1104_s6 = scalar_select %p956_p12, 1, 0 }
  0x12   : > { %s965_s12 = scalar_lea.hbm %s1094_s0, %s675_s8  ;;  %s191_s13 = scalar_lea.vmem [#allocation3], %s644_s9 }
  0x13   : > { %s198_s14 = sshll.u32 %s191_s13, 4  ;;  %p969_p13 = pnand %p701_p10, %p941_p5  ;;  %s973_s14 = int_to_ptr.vmem [resolvable:$true] %s198_s14 }
  0x14   : > { %s975_s16 = scalar_lea.sflag [#allocation4], %s187_s7  ;;  %s758_s17 = scalar_lea.hbm %s965_s12, 256 }
  0x15   : > { %p759_p0 = scmp.ne.s32.totalorder %s965_s12, %s758_s17  ;;  %p760_p1 = pneg %p969_p13 }
  0x16   : > { %s763_s26 = scalar_lea.hbm %s1094_s0, 512  ;;  %p764_p4 = scmp.lt.u32.totalorder %s965_s12, %s1094_s0 }
  0x17   : > { %p761_p2 = pnand %p760_p1, %p759_p0  ;;  %p765_p5 = scmp.lt.u32.totalorder %s763_s26, %s758_s17 }
  0x18   : > { %p767_p8 = scmp.lt.u32.totalorder %s758_s17, %s965_s12 }
  0x19   : > { %p762_p3 = pneg %p761_p2  ;;  %p766_p7 = por %p765_p5, %p764_p4 }
  0x1b   : > { %p768_p10 = por %p767_p8, %p766_p7 }
  0x1d   : > { %p769_p9 = pnand %p768_p10, %p762_p3 }
  0x1f   : > { %772 = shalt.err (!%p769_p9)
}
  0x20   : > { %s773_s7 = scalar_lea.vmem %s973_s14, 256  ;;  %s856_s9 = smov [#allocation3]  }
  0x21   : > { %p774_p0 = scmp.ne.s32.totalorder %s973_s14, %s773_s7  ;;  %s778_s10 = sshll.u32 %s856_s9, 4  ;;  %s779_s10 = int_to_ptr.vmem [resolvable:$false] %s778_s10 }
  0x22   : > { %s780_s11 = scalar_lea.vmem %s779_s10, 512  ;;  %p781_p11 = scmp.lt.s32.totalorder %s973_s14, %s779_s10 }
  0x23   : > { %p776_p2 = pnand %p774_p0, %p760_p1  ;;  %p782_p4 = scmp.lt.s32.totalorder %s780_s11, %s773_s7 }
  0x25   : > { %p777_p12 = pneg %p776_p2  ;;  %p783_p5 = por %p782_p4, %p781_p11 }
  0x27   : > { %p784_p7 = pnand %p783_p5, %p777_p12 }
  0x29   : > { %787 = shalt.err (!%p784_p7)
}
  0x2a   : > { %s857_s13 = smov 128   ;;  %s858_s17 = smov 8  }
  0x2b   : > { %696 = dma.hbm_to_vmem [thread:$0]  (!%p969_p13), %s965_s12, 256, %s973_s14, %s975_s16, %s857_s13, %s857_s13, %s858_s17  }
  0x2c   : > { %p647_p9 = scmp.ge.s32.totalorder %s854_s21, 1  ;;  %p206_p1 = scmp.lt.s32.totalorder %s854_s21, 3 }
  0x2e   : > { %p207_p3 = pnand %p647_p9, %p206_p1 }
  0x2f   : > { %s1006_s23 = sand.u32 (!%p207_p3), 1, %s846_s19  }
  0x30   : > { %210 = sbr.rel (%p207_p3) target bundleno = 661 (0x295), region = 40  ;;  %s648_s25 = sshll.u32 (!%p207_p3), %s1006_s23, 4 }
  0x31   : > { %s213_s26 = scalar_lea.sflag (!%p207_p3), [#allocation4], %s1006_s23  ;;  %s216_s28 = scalar_lea.vmem (!%p207_p3), [#allocation3], %s648_s25 }
  0x37   : > { %833 = dma.done.wait (%p945_p6), %s213_s26, 256  }
  0x38   : > { %835 = vsyncadd (%p945_p6), %s213_s26, 4294967040  ;;  %v859_v0 = vmov 0   ;;  %v751_v1 = vld [vmem:[%s216_s28] ss:$8 sps:$4 sm:$0xff]   ;;  %v753_v2 = vld [vmem:[%s216_s28 + $0x4] ss:$8 sps:$4 sm:$0xff]  }
  0x39   : > { %433 = vmatprep.subr.bf16.mxu0 %v859_v0  ;;  %750 = vset.pattern.permute.xlu1 %v859_v0  ;;  %s860_s12 = smov 126   ;;  %s861_s14 = smov 127   ;;  %v754_v3 = vld [vmem:[%s216_s28] ss:$8 sps:$4 sm:$0xff]   ;;  %v757_v4 = vld [vmem:[%s1095_s1 + $0x4] ss:$8 sps:$4 sm:$0xff]  }
  0x3a   : > { %749 = vset.pattern.permute.xlu0 %v859_v0  ;;  %281 = vrot.lane.b32.xlu1 %v751_v1, %s860_s12  ;;  %s862_s29 = smov 112   ;;  %s863_s15 = smov 111   ;;  %vm429_vm0 = vcmask 130048   ;;  %v409_v5 = vld [vmem:[%s1096_s2 + $0x8] sm:$0xff]  ;;  %v408_v6 = vld [vmem:[%s1096_s2] sm:$0xff]  ;;  %vm267_vm1 = vcmask 1039360  }
  0x3b   : > { %263 = vrot.lane.b32.xlu0 %v751_v1, %s861_s14  ;;  %434 = vmatpush1.bf16.msra.mxu0 %v754_v3  ;;  %s864_s16 = smov 110   ;;  %s865_s8 = smov 96   ;;  %v477_v7 = vld [vmem:[%s1098_s4] sm:$0xf]  ;;  %vm285_vm2 = vcmask 1031168   ;;  %vm303_vm3 = vcmask 916480  }
  0x3c   : > { %435 = vmatprep.subr.bf16.mxu0 %v859_v0  ;;  %669 = vmatprep.mubr.msk.bf16.mxu0 %vm429_vm0, %v757_v4  ;;  %s866_s10 = smov 95   ;;  %s867_s11 = smov 94   ;;  %vm321_vm4 = vcmask 908288   ;;  %vm339_vm5 = vcmask 900096   ;;  %vm357_vm6 = vcmask 785408   ;;  %vm375_vm7 = vcmask 777216  }
  0x3d   : > { %vm393_vm8 = vcmask 769024   ;;  %v755_v32 = vld [vmem:[%s1095_s1] ss:$8 sps:$4 sm:$0xff]   ;;  %v868_v33 = vmov 0.0|0.0   ;;  %vm869_vm9 = vmmov 0   ;;  %v870_v34 = vmov 0.0  }
  0x3e   : > { %283 = vrot.lane.b32.xlu1 %v753_v2, %s860_s12  ;;  %686 = vmatprep.subr.bf16.mxu1 %v868_v33  ;;  %v476_v46 = vld [vmem:[%s1097_s3] sm:$0xf]  ;;  %s672_s7 = sshll.u32 %s923_s22, 6  ;;  %s558_s25 = scalar_lea.sflag [#allocation5], %s1006_s23 }
  0x3f   : > { %265 = vrot.lane.b32.xlu0 %v753_v2, %s861_s14  ;;  %683 = vmatprep.mubr.msk.f32.mxu1 %vm869_vm9, %v870_v34  ;;  %s1050_s17 = scalar_lea.hbm %s1099_s5, %s672_s7  ;;  %p1106_p11 = scmp.ne.s32.totalorder %s1103_s30, 0 }
  0x40   : > { %s871_s22 = smov [#allocation6]  }
  0x41   : > { %s792_s28 = sshll.u32 %s871_s22, 4  ;;  %s793_s28 = int_to_ptr.vmem [resolvable:$false] %s792_s28 }
  0x42   : > { %301 = vrot.lane.b32.xlu1 %v753_v2, %s862_s29  ;;  %s794_s12 = scalar_lea.vmem %s793_s28, 128 }
  0x43   : > { %299 = vrot.lane.b32.xlu0 %v751_v1, %s862_s29 }
  0x46   : > { %319 = vrot.lane.b32.xlu1 %v753_v2, %s863_s15 }
  0x47   : > { %317 = vrot.lane.b32.xlu0 %v751_v1, %s863_s15 }
  0x4a   : > { %337 = vrot.lane.b32.xlu1 %v753_v2, %s864_s16 }
  0x4b   : > { %335 = vrot.lane.b32.xlu0 %v751_v1, %s864_s16 }
  0x4e   : > { %355 = vrot.lane.b32.xlu1 %v753_v2, %s865_s8 }
  0x4f   : > { %353 = vrot.lane.b32.xlu0 %v751_v1, %s865_s8  ;;  %s649_s8 = sshll.u32 %s1006_s23, 2 }
  0x50   : > { %s242_s9 = scalar_lea.vmem [#allocation6], %s649_s8 }
  0x52   : > { %373 = vrot.lane.b32.xlu1 %v753_v2, %s866_s10 }
  0x53   : > { %371 = vrot.lane.b32.xlu0 %v751_v1, %s866_s10  ;;  %s571_s10 = sshll.u32 %s242_s9, 4  ;;  %s1052_s10 = int_to_ptr.vmem [resolvable:$true] %s571_s10 }
  0x54   : > { %s788_s26 = scalar_lea.vmem %s1052_s10, 64  ;;  %p795_p8 = scmp.lt.s32.totalorder %s1052_s10, %s793_s28 }
  0x55   : > { %p789_p6 = scmp.ne.s32.totalorder %s1052_s10, %s788_s26  ;;  %p796_p10 = scmp.lt.s32.totalorder %s794_s12, %s788_s26 }
  0x56   : > { %391 = vrot.lane.b32.xlu1 %v753_v2, %s867_s11 }
  0x57   : > { %389 = vrot.lane.b32.xlu0 %v751_v1, %s867_s11  ;;  %p790_p12 = pnand %p789_p6, %p1106_p11  ;;  %p797_p0 = por %p796_p10, %p795_p8 }
  0x59   : > { %p791_p13 = pneg %p790_p12 }
  0x5a   : > { %417 = vperm.xlu1 %750, %v409_v5  }
  0x5b   : > { %412 = vperm.xlu0 %749, %v408_v6   ;;  %p798_p2 = pnand %p797_p0, %p791_p13 }
  0x5e   : > { %480 = vperm.xlu1 %750, %v477_v7  }
  0xac   : > { %v282_v8 = vpop.permute.xlu1 %281 }
  0xad   : > { %v264_v9 = vpop.permute.xlu0 %263 }
  0xb0   : > { %v284_v10 = vpop.permute.xlu1 %283 }
  0xb1   : > { %v266_v11 = vpop.permute.xlu0 %265  ;;  %v286_v15 = vsel %vm285_vm2, %v282_v8, %v284_v10 }
  0xb2   : > { %v268_v12 = vsel %vm267_vm1, %v264_v9, %v266_v11 }
  0xb3   : > { %436 = vmatpush1.bf16.msra.mxu0 %v268_v12 }
  0xb4   : > { %437 = vmatprep.subr.bf16.mxu0 %v859_v0  ;;  %v302_v13 = vpop.permute.xlu1 %301 }
  0xb5   : > { %v300_v14 = vpop.permute.xlu0 %299 }
  0xb6   : > { %v304_v16 = vsel %vm303_vm3, %v300_v14, %v302_v13 }
  0xb7   : > { %438 = vmatpush1.bf16.msra.mxu0 %v286_v15 }
  0xb8   : > { %439 = vmatprep.subr.bf16.mxu0 %v859_v0  ;;  %v320_v17 = vpop.permute.xlu1 %319 }
  0xb9   : > { %v318_v18 = vpop.permute.xlu0 %317 }
  0xba   : > { %v322_v19 = vsel %vm321_vm4, %v318_v18, %v320_v17 }
  0xbb   : > { %440 = vmatpush1.bf16.msra.mxu0 %v304_v16 }
  0xbc   : > { %441 = vmatprep.subr.bf16.mxu0 %v859_v0  ;;  %v338_v20 = vpop.permute.xlu1 %337 }
  0xbd   : > { %v336_v21 = vpop.permute.xlu0 %335 }
  0xbe   : > { %v340_v22 = vsel %vm339_vm5, %v336_v21, %v338_v20 }
  0xbf   : > { %442 = vmatpush1.bf16.msra.mxu0 %v322_v19 }
  0xc0   : > { %443 = vmatprep.subr.bf16.mxu0 %v859_v0  ;;  %v356_v23 = vpop.permute.xlu1 %355 }
  0xc1   : > { %v354_v24 = vpop.permute.xlu0 %353 }
  0xc2   : > { %v358_v25 = vsel %vm357_vm6, %v354_v24, %v356_v23 }
  0xc3   : > { %444 = vmatpush1.bf16.msra.mxu0 %v340_v22 }
  0xc4   : > { %445 = vmatprep.subr.bf16.mxu0 %v859_v0  ;;  %v374_v26 = vpop.permute.xlu1 %373 }
  0xc5   : > { %v372_v27 = vpop.permute.xlu0 %371 }
  0xc6   : > { %v376_v28 = vsel %vm375_vm7, %v372_v27, %v374_v26 }
  0xc7   : > { %446 = vmatpush1.bf16.msra.mxu0 %v358_v25 }
  0xc8   : > { %447 = vmatprep.subr.bf16.mxu0 %v859_v0  ;;  %v392_v29 = vpop.permute.xlu1 %391 }
  0xc9   : > { %v390_v30 = vpop.permute.xlu0 %389 }
  0xca   : > { %v394_v31 = vsel %vm393_vm8, %v390_v30, %v392_v29 }
  0xcb   : > { %448 = vmatpush1.bf16.msra.mxu0 %v376_v28 }
  0xcc   : > { %449 = vmatprep.subr.bf16.mxu0 %v859_v0 }
  0xcf   : > { %450 = vmatpush1.bf16.msra.mxu0 %v394_v31 }
  0xd2   : > { %466 = vmatmul.mubr.bf16.vlgmr.msra.gmra.mrb[0].mxu0 %v755_v32 }
  0xd9   : > { %v418_v39 = vpop.permute.xlu1 %417 }
  0xda   : > { %v413_v35 = vpop.permute.xlu0 %412 }
  0xdd   : > { %v481_v47 = vpop.permute.xlu1 %480 }
 0x1a5   : > { %v467_v36 = vpop.f32.mrb[0].mxu0 }
 0x1a6   : > { %v468_v37 = vadd.f32 %v467_v36, %v413_v35  ;;  %v469_v38 = vpop.f32.mrb[1].mxu0 }
 0x1a7   : > { %v470_v40 = vpop.f32.mrb[2].mxu0 }
 0x1a8   : > { %v471_v41 = vadd.f32 %v470_v40, %v418_v39  ;;  %v472_v42 = vpop.f32.mrb[3].mxu0  ;;  %v474_v43 = vmax.f32 %v468_v37, 0.0 }
 0x1aa   : > { %v475_v44 = vmax.f32 %v471_v41, 0.0 }
 0x1ac   : > { %v687_v45 = vpack.c.bf16 %v475_v44, %v474_v43 }
 0x1ae   : > { %688 = vmatpush3.bf16.msra.mxu1 %v687_v45 }
 0x1b1   : > { %684 = vmatmul.mubr.msk.f32.vlgmr.msra.gmra.mrb[0].mxu1 %vm429_vm0, %v476_v46 }
 0x284   : > { %v552_v48 = vpop.f32.mrb[0].mxu1 }
 0x285   : > { %v553_v49 = vadd.f32 %v552_v48, %v481_v47  ;;  %v685_v50 = vpop.f32.mrb[1].mxu1 }
 0x287   : > { %556 = vst [vmem:[%s242_s9] sm:$0xf] %v553_v49 }
 0x288   : > { %801 = shalt.err (!%p798_p2)
}
 0x289   : > { %s802_s23 = scalar_lea.hbm %s1050_s17, 64  ;;  %s806_s15 = scalar_lea.hbm %s1099_s5, 128 }
 0x28a   : > { %p803_p4 = scmp.ne.s32.totalorder %s1050_s17, %s802_s23  ;;  %p807_p9 = scmp.lt.u32.totalorder %s1050_s17, %s1099_s5 }
 0x28b   : > { %p808_p1 = scmp.lt.u32.totalorder %s806_s15, %s802_s23  ;;  %p810_p6 = scmp.lt.u32.totalorder %s802_s23, %s1050_s17 }
 0x28c   : > { %p804_p5 = pnand %p803_p4, %p1106_p11 }
 0x28d   : > { %p809_p3 = por %p808_p1, %p807_p9 }
 0x28e   : > { %p805_p7 = pneg %p804_p5 }
 0x28f   : > { %p811_p12 = por %p810_p6, %p809_p3 }
 0x291   : > { %p812_p13 = pnand %p811_p12, %p805_p7 }
 0x293   : > { %815 = shalt.err (!%p812_p13)
}
 0x294   : > { %691 = dma.vmem_to_hbm [thread:$0]  (%p1106_p11), %s1052_s10, 64, %s1050_s17, %s558_s25  }
 0x295 PF: > { %s583_s7 = sand.u32 1, %s842_s18   ;;  %p1107_p8 = scmp.ne.s32.totalorder %s1104_s6, 0 }
 0x296   : > { %p1108_p10 = scmp.ge.s32.totalorder %s854_s21, 2  ;;  %s584_s9 = scalar_lea.sflag [#allocation5], %s583_s7 }
 0x298   : > { %p698_p0 = pnand %p1108_p10, %p1107_p8 }
 0x29a   : > { %837 = dma.done.wait (!%p698_p0), %s584_s9, 64  }
 0x29b   : > { %839 = vsyncadd (!%p698_p0), %s584_s9, 4294967232  ;;  %p18_p2 = scmp.ge.s32.totalorder %s927_s24, 4   ;;  %s1109_s18 = smov %s846_s19 }
 0x29c   : > { %s1110_s19 = smov %s850_s20  ;;  %s1111_s20 = smov %s939_s27 }
 0x29d   : > { %s1112_s21 = smov %s927_s24  ;;  %20 = sbr.rel (!%p18_p2) target bundleno = 5 (0x5), region = 85 }
 0x2a4   :  { %589 = vsyncpa [#allocation4], 1 }
 0x2a5   :  { %591 = vsyncpa [#allocation4 + $0x1], 1 }
 0x2a6   :  { %592 = vsyncpa [#allocation5], 1 }
 0x2a7   :  { %594 = vsyncpa [#allocation5 + $0x1], 1 }

</bundles_post_ra>
